<compile_context>
chip_gen: v6e
topology: v6e:2x2x1
jax: 0.10.0
libtpu: 0.0.40
codegen_flags: <defaults>
</compile_context>

<pallas_src>
import functools
import math

import jax
import jax.numpy as jnp
from jax.experimental import pallas as pl
from jax.experimental.pallas import tpu as pltpu


def _round_up(x, m):
    return ((x + m - 1) // m) * m


def _padded_bytes(rows, cols, itemsize):
    """Physical VMEM footprint of a (rows, cols) buffer incl. sublane/lane padding."""
    sub = 8 * max(1, 4 // itemsize)          # 8 rows/tile for f32, 16 for bf16
    return _round_up(rows, sub) * _round_up(cols, 128) * itemsize


def _vmem_budget_bytes():
    """~3/4 of physical VMEM (96 MiB on v5e/v6e, ~48 MiB on v7x); safe fallback."""
    cap = 64 * 1024 * 1024
    try:
        info = pltpu.get_tpu_info()
        cap = int(getattr(info, "vmem_capacity_bytes", cap))
    except Exception:
        pass
    return int((cap * 3) // 4)


# --------------------------------------------------------------------------------------
# Stage 1: support2d[v, b*Fop + f] = sum_i x[b, v, i] * W[i, f]
# --------------------------------------------------------------------------------------
def _support_kernel(x_ref, w_ref, o_ref):
    o_ref[...] = jnp.dot(
        x_ref[...], w_ref[...], preferred_element_type=jnp.float32
    ).astype(o_ref.dtype)


# --------------------------------------------------------------------------------------
# Stage 2: out2d = adj @ support2d (+ bias), accumulated over node-contraction tiles.
# --------------------------------------------------------------------------------------
def _adj_kernel(*refs, has_bias):
    if has_bias:
        adj_ref, sup_ref, bias_ref, o_ref, acc_ref = refs
    else:
        adj_ref, sup_ref, o_ref, acc_ref = refs
        bias_ref = None

    vi = pl.program_id(2)

    @pl.when(vi == 0)
    def _init():
        acc_ref[...] = jnp.zeros_like(acc_ref)

    acc_ref[...] += jnp.dot(adj_ref[...], sup_ref[...],
                            preferred_element_type=jnp.float32)

    @pl.when(vi == pl.num_programs(2) - 1)
    def _finalize():
        r = acc_ref[...]
        if has_bias:
            r = r + bias_ref[...]          # f32 bias, broadcast over node rows
        o_ref[...] = r.astype(o_ref.dtype)


def graph_convolution(x, adj, weight, bias=None, *, use_bf16=False):
    """GCN forward.  x: (B, V, F_in), adj: (V, V), weight: (F_in, F_out),
    bias: (F_out,) or None.  Returns (B, V, F_out)."""
    B, V, F_in = x.shape
    F_in_w, F_out = weight.shape
    assert F_in_w == F_in, "weight first dim must match x feature dim"
    assert adj.shape == (V, V)

    out_dtype = jnp.result_type(x.dtype, weight.dtype)
    # Explicit choice: with use_bf16, adj/x/W are downcast to bf16 for the MXU while all
    # accumulation stays f32 (GCN-tolerant; halves adjacency HBM/VMEM traffic).
    compute_dtype = jnp.bfloat16 if use_bf16 else out_dtype
    isz = jnp.dtype(compute_dtype).itemsize
    osz = jnp.dtype(out_dtype).itemsize
    sublane = 8 * max(1, 4 // isz)           # 8 for f32, 16 for bf16

    # ---- pad to TPU-friendly sizes ---------------------------------------------------
    Vp = _round_up(V, 128)                   # node dim (lane dim of adj tiles)
    Fip = _round_up(F_in, sublane)           # sublane-aligned input features
    Fop = _round_up(F_out, 128)              # lane-dense output features
    Np = B * Fop                             # flattened (batch, feature) lane dim

    x_p = jnp.pad(x, ((0, 0), (0, Vp - V), (0, Fip - F_in))).astype(compute_dtype)
    adj_p = jnp.pad(adj, ((0, Vp - V), (0, Vp - V))).astype(compute_dtype)
    w_p = jnp.pad(weight, ((0, Fip - F_in), (0, Fop - F_out))).astype(compute_dtype)

    budget = _vmem_budget_bytes()

    # ---------------------------- Stage 1: support = x @ W ----------------------------
    tvs_cands = [c for c in (1024, 512, 256, 128) if Vp % c == 0] or [Vp]

    def _stage1_bytes(tvs):
        return 2 * (_padded_bytes(tvs, Fip, isz)      # x block (double buffered)
                    + _padded_bytes(Fip, Fop, isz)    # W (resident)
                    + _padded_bytes(tvs, Fop, isz))   # support block

    TVs = next((c for c in tvs_cands if _stage1_bytes(c) <= budget), tvs_cands[-1])

    sup2d = pl.pallas_call(
        _support_kernel,
        out_shape=jax.ShapeDtypeStruct((Vp, Np), compute_dtype),
        grid_spec=pltpu.PrefetchScalarGridSpec(
            num_scalar_prefetch=0,
            grid=(B, Vp // TVs),
            in_specs=[
                pl.BlockSpec((None, TVs, Fip), lambda b, v: (b, v, 0)),   # x (b squeezed)
                pl.BlockSpec((Fip, Fop), lambda b, v: (0, 0)),            # W resident
            ],
            out_specs=pl.BlockSpec((TVs, Fop), lambda b, v: (v, b)),      # node-major
        ),
        compiler_params=pltpu.CompilerParams(
            dimension_semantics=("parallel", "parallel"),
            vmem_limit_bytes=int(budget),
        ),
        cost_estimate=pl.CostEstimate(
            flops=2 * B * Vp * Fip * Fop,
            transcendentals=0,
            bytes_accessed=int((x_p.size + w_p.size + Vp * Np) * isz),
        ),
    )(x_p, w_p)

    # ------------------------ Stage 2: out2d = adj @ support2d ------------------------
    has_bias = bias is not None

    tu_cands = [c for c in (512, 256, 128) if Vp % c == 0] or [Vp]
    tv_cands = [c for c in (2048, 1024, 512, 256, 128) if Vp % c == 0] or [Vp]
    tn_cands = [Np] + [c for c in (4096, 2048, 1024, 512, 256, 128)
                       if c < Np and Np % c == 0]

    def _stage2_bytes(tu, tv, tn):
        b = 2 * (_padded_bytes(tu, tv, isz)        # adj (double buffered)
                 + _padded_bytes(tv, tn, isz)      # support
                 + _padded_bytes(tu, tn, osz))     # output
        b += _padded_bytes(tu, tn, 4)              # f32 accumulator scratch
        if has_bias:
            b += 2 * _padded_bytes(1, tn, 4)       # f32 bias
        return b

    def _pick_tiles():
        for tn in tn_cands:                        # max TN first: adj streamed once
            for tu in tu_cands:                    # then TU: fewer support re-reads
                for tv in tv_cands:                # then TV: bigger DMAs
                    if _stage2_bytes(tu, tv, tn) <= budget:
                        return tu, tv, tn
        return tu_cands[-1], tv_cands[-1], tn_cands[-1]

    TU, TV, TN = _pick_tiles()

    # Guarantee >= 2 steps along the parallel axes so v7x's two TensorCores both work.
    if (Np // TN) * (Vp // TU) < 2:
        TU = max(8, Vp // 2)                       # Vp is a multiple of 128 -> TU % 8 == 0

    grid = (Np // TN, Vp // TU, Vp // TV)

    in_specs = [
        pl.BlockSpec((TU, TV), lambda ni, ui, vi: (ui, vi)),   # adj tile
        pl.BlockSpec((TV, TN), lambda ni, ui, vi: (vi, ni)),   # support tile
    ]
    args = [adj_p, sup2d]
    if has_bias:
        bias_p = jnp.tile(jnp.pad(bias.astype(jnp.float32), (0, Fop - F_out)), B)
        bias_p = bias_p.reshape(1, Np)
        in_specs.append(pl.BlockSpec((1, TN), lambda ni, ui, vi: (0, ni)))
        args.append(bias_p)
    out_specs = pl.BlockSpec((TU, TN), lambda ni, ui, vi: (ui, ni))

    adj_bytes = (Np // TN) * Vp * Vp * isz
    sup_bytes = (Vp // TU) * Vp * Np * isz
    out_bytes = Vp * Np * osz

    kernel = functools.partial(_adj_kernel, has_bias=has_bias)

    out2d = pl.pallas_call(
        kernel,
        out_shape=jax.ShapeDtypeStruct((Vp, Np), out_dtype),
        grid_spec=pltpu.PrefetchScalarGridSpec(
            num_scalar_prefetch=0,
            grid=grid,
            in_specs=in_specs,
            out_specs=out_specs,
            scratch_shapes=[pltpu.VMEM((TU, TN), jnp.float32)],
        ),
        compiler_params=pltpu.CompilerParams(
            dimension_semantics=("parallel", "parallel", "arbitrary"),
            vmem_limit_bytes=int(budget),
        ),
        cost_estimate=pl.CostEstimate(
            flops=2 * Vp * Vp * Np,
            transcendentals=0,
            bytes_accessed=int(adj_bytes + sup_bytes + out_bytes),
        ),
    )(*args)

    # out2d[u, b*Fop + f] == output[b, u, f]; unflatten + slice away padding.
    out = out2d.reshape(Vp, B, Fop).transpose(1, 0, 2)
    return out[:, :V, :F_out]


if __name__ == "__main__":
    # Small shapes consistent with the module: batch=2, nodes=16, in=8, out=32.
    B, V, F_in, F_out = 2, 16, 8, 32

    key = jax.random.PRNGKey(0)
    k_x, k_adj, k_w, k_b = jax.random.split(key, 4)

    # Parameter init mirroring reset_parameters(): uniform(-stdv, stdv), stdv=1/sqrt(F_out).
    stdv = 1.0 / math.sqrt(F_out)
    weight = jax.random.uniform(k_w, (F_in, F_out), jnp.float32, -stdv, stdv)
    bias = jax.random.uniform(k_b, (F_out,), jnp.float32, -stdv, stdv)

    x = jax.random.normal(k_x, (B, V, F_in), jnp.float32)
    adj = jax.random.uniform(k_adj, (V, V), jnp.float32)

    # Pallas kernel (with bias).
    out = jax.block_until_ready(graph_convolution(x, adj, weight, bias))

    # Pure-JAX reference.
    support_ref = jnp.matmul(x, weight)
    ref = jnp.einsum("uv,bvi->bui", adj, support_ref) + bias
    assert out.shape == (B, V, F_out)
    assert jnp.allclose(out, ref, atol=1e-4, rtol=1e-4), "mismatch vs reference (bias)"

    # bias=None path (no bias input at all).
    out_nb = jax.block_until_ready(graph_convolution(x, adj, weight, None))
    ref_nb = jnp.einsum("uv,bvi->bui", adj, support_ref)
    assert jnp.allclose(out_nb, ref_nb, atol=1e-4, rtol=1e-4), "mismatch vs reference (no bias)"

    print("KERNEL_OK")
</pallas_src>

<mosaic_0001>
module attributes {stable_mosaic.version = 11 : i64} {
  func.func @_support_kernel(%arg0: i32, %arg1: i32, %arg2: memref<1x128x8xf32, #tpu.memory_space<vmem>>, %arg3: memref<8x128xf32, #tpu.memory_space<vmem>>, %arg4: memref<128x128xf32, #tpu.memory_space<vmem>>) attributes {dimension_semantics = [#tpu.dimension_semantics<parallel>, #tpu.dimension_semantics<parallel>], iteration_bounds = array<i64: 2, 1>, scalar_prefetch = 0 : i64, scratch_operands = 0 : i64, tpu.core_type = #tpu.core_type<tc>, window_params = [{transform_indices = @transform_0, window_bounds = array<i64: 1, 128, 8>}, {pipeline_mode = #tpu.pipeline_mode<synchronous>, transform_indices = @transform_1, window_bounds = array<i64: 8, 128>}, {transform_indices = @transform_2, window_bounds = array<i64: 128, 128>}]} {
    %c0 = arith.constant 0 : index
    %c0_0 = arith.constant 0 : index
    %c0_1 = arith.constant 0 : index
    %0 = vector.load %arg2[%c0, %c0_0, %c0_1] : memref<1x128x8xf32, #tpu.memory_space<vmem>>, vector<1x128x8xf32>
    %1 = vector.shape_cast %0 : vector<1x128x8xf32> to vector<128x8xf32>
    %c0_2 = arith.constant 0 : index
    %c0_3 = arith.constant 0 : index
    %2 = vector.load %arg3[%c0_2, %c0_3] : memref<8x128xf32, #tpu.memory_space<vmem>>, vector<8x128xf32>
    %cst = arith.constant dense<0.000000e+00> : vector<128x128xf32>
    %3 = tpu.matmul %1, %2, %cst {dimension_numbers = #tpu.dot_dimension_numbers<[1], [0], [0], [1], [0, 0, 1, 1], [], []>} : vector<128x8xf32>, vector<8x128xf32>, vector<128x128xf32> -> vector<128x128xf32>
    %c0_4 = arith.constant 0 : index
    %c0_5 = arith.constant 0 : index
    %4 = vector.load %arg4[%c0_4, %c0_5] : memref<128x128xf32, #tpu.memory_space<vmem>>, vector<128x128xf32>
    tpu.vector_store %arg4[%c0_4, %c0_5], %3 {strides = array<i32>} : memref<128x128xf32, #tpu.memory_space<vmem>>, vector<128x128xf32>,
    return
  }
  func.func @transform_0(%arg0: i32, %arg1: i32) -> (i32, i32, i32) {
    %c0_i32 = arith.constant 0 : i32
    %c0_i32_0 = arith.constant 0 : i32
    return %arg0, %arg1, %c0_i32 : i32, i32, i32
  }
  func.func @transform_1(%arg0: i32, %arg1: i32) -> (i32, i32) {
    %c0_i32 = arith.constant 0 : i32
    %c0_i32_0 = arith.constant 0 : i32
    %c0_i32_1 = arith.constant 0 : i32
    return %c0_i32, %c0_i32_0 : i32, i32
  }
  func.func @transform_2(%arg0: i32, %arg1: i32) -> (i32, i32) {
    %c0_i32 = arith.constant 0 : i32
    return %arg1, %arg0 : i32, i32
  }
}

</mosaic_0001>

<bundles_post_ra>
// kernel: tpu_custom_call.1
= control target key start
LH: loop header
LB: loop body
LE: loop exit
PB: predicated region body
PF: predicated region fallthrough
CT: control target
= control target key end

     0   :  { %7 = vsyncpa [#allocation3], 0  ;;  %s879_s0 = inlined_call_operand.vmem [shape: f32[2,128,8], index: 0, kind: input, shape index: {}]   ;;  %s880_s1 = inlined_call_operand.vmem [shape: f32[8,128], index: 1, kind: input, shape index: {}]   ;;  %s881_s2 = inlined_call_operand.hbm [shape: f32[128,256], index: 2, kind: output, shape index: {}]  }
   0x1   :  { %9 = vsyncpa [#allocation3 + $0x1], 0  ;;  %s723_s9 = smov 0   ;;  %s725_s10 = smov 0  }
   0x2   :  { %s727_s11 = smov 0   ;;  %s729_s12 = smov 0  }
   0x3   :  { %s731_s13 = smov 0   ;;  %s733_s14 = smov 0  }
   0x4 LB: > { %s494_s15 = sadd.s32 4294967295, %s702_s14   ;;  %s495_s16 = sadd.s32 4294967294, %s702_s14   ;;  %s702_s14 = sphi %s733_s14, %s15_s14   ;;  %s698_s13 = sphi %s731_s13, %s888_s13   ;;  %s694_s12 = sphi %s729_s12, %s887_s12   ;;  %s690_s11 = sphi %s727_s11, %s886_s11   ;;  %s686_s10 = sphi %s725_s10, %s885_s10   ;;  %s682_s9 = sphi %s723_s9, %s884_s9  }
   0x5   : > { %s27_s17 = sadd.s32 1, %s698_s13  ;;  %s85_s18 = sadd.s32 1, %s690_s11 }
   0x6   : > { %p29_p0 = scmp.ge.s32.totalorder %s27_s17, 2  ;;  %p95_p1 = scmp.ne.s32.totalorder %s690_s11, %s686_s10 }
   0x7   : > { %p96_p2 = scmp.eq.s32.totalorder %s494_s15, 1  ;;  %p101_p3 = scmp.ne.s32.totalorder %s686_s10, %s682_s9 }
   0x8   : > { %s890_s17 = smov (%p29_p0, %s27_s17), 0  ;;  %p102_p5 = scmp.eq.s32.totalorder %s495_s16, 1 }
   0x9   : > { %p763_p4 = por %p96_p2, %p95_p1  ;;  %s81_s20 = ssub.s32 %s698_s13, %s890_s17 }
   0xa   : > { %p498_p6 = scmp.ge.s32.totalorder %s702_s14, 1  ;;  %p83_p7 = scmp.eq.s32.totalorder %s81_s20, 0 }
   0xb   : > { %p770_p8 = por %p102_p5, %p101_p3  ;;  %p136_p9 = scmp.lt.s32.totalorder %s702_s14, 3 }
   0xc   : > { %s776_s22 = scalar_select %p83_p7, %s690_s11, %s85_s18  }
   0xd   : > { %p137_p10 = pnand %p498_p6, %p136_p9 }
   0xe   : > { %p163_p11 = scmp.lt.s32.totalorder (!%p137_p10), %s694_s12, 1  ;;  %s159_s30 = sand.u32 (!%p137_p10), 1, %s686_s10  }
   0xf   : > { %140 = sbr.rel (%p137_p10) target bundleno = 249 (0xf9), region = 28  ;;  %s499_s3 = sshll.u32 (!%p137_p10), %s159_s30, 7 }
  0x10   : > { %s805_s4 = scalar_lea.vmem (!%p137_p10), [#allocation2], %s499_s3  ;;  %s519_s5 = sshll.u32 (!%p137_p10), %s694_s12, 7 }
  0x11   : > { %s416_s6 = sshll.u32 (!%p137_p10), %s805_s4, 4  ;;  %s824_s15 = scalar_lea.hbm (!%p137_p10), %s881_s2, %s519_s5  ;;  %s826_s6 = int_to_ptr.vmem [resolvable:$true] %s416_s6 }
  0x12   : > { %s626_s16 = scalar_lea.vmem (!%p137_p10), %s826_s6, 2048  ;;  %s704_s18 = smov (!%p137_p10), [#allocation2]  }
  0x13   : > { %p627_p12 = scmp.ne.s32.totalorder (!%p137_p10), %s826_s6, %s626_s16  ;;  %s630_s20 = sshll.u32 (!%p137_p10), %s704_s18, 4  ;;  %s631_s20 = int_to_ptr.vmem [resolvable:$false] %s630_s20 }
  0x14   : > { %v189_v0 = vld [vmem:[%s880_s1] sm:$0xff]  ;;  %s164_s25 = scalar_select %p163_p11, %s694_s12, 1  ;;  %vm190_vm0 = vcmask 64512  }
  0x15   : > { %540 = vmatprep.subr.mxu0 %v189_v0  ;;  %566 = vmatprep.subr.mxu1 %v189_v0  ;;  %s834_s12 = scalar_lea.sflag [#allocation3], %s159_s30  ;;  %p628_p13 = pnand %p627_p12, %p763_p4 }
  0x16   : > { %541 = vmatpush3.msra.mxu0 %v189_v0  ;;  %567 = vmatpush3.msra.mxu1 %v189_v0  ;;  %s522_s26 = sshll.u32 %s164_s25, 7  ;;  %s632_s23 = scalar_lea.vmem %s631_s20, 4096 }
  0x17   : > { %s170_s29 = scalar_lea.vmem %s879_s0, %s522_s26  ;;  %p629_p0 = pneg %p628_p13 }
  0x18   : > { %v173_v1 = vld [vmem:[%s170_s29] sm:$0xff]  ;;  %v174_v3 = vld [vmem:[%s170_s29 + $0x8] sm:$0xff]  ;;  %v175_v5 = vld [vmem:[%s170_s29 + $0x10] sm:$0xff]  ;;  %p633_p1 = scmp.lt.s32.totalorder %s826_s6, %s631_s20  ;;  %p634_p2 = scmp.lt.s32.totalorder %s632_s23, %s626_s16 }
  0x19   : > { %v181_v2 = vld [vmem:[%s170_s29 + $0x40] sm:$0xff]  ;;  %542 = vmatprep.mubr.msk.f32.mxu0 %vm190_vm0, %v173_v1  ;;  %v182_v4 = vld [vmem:[%s170_s29 + $0x48] sm:$0xff]  ;;  %v183_v6 = vld [vmem:[%s170_s29 + $0x50] sm:$0xff] }
  0x1a   : > { %554 = vmatprep.mubr.msk.f32.mxu1 %vm190_vm0, %v181_v2  ;;  %543 = vmatmul.mubr.msk.f32.vlgmr.msra.gmra.mxu0 %vm190_vm0, %v174_v3  ;;  %v176_v7 = vld [vmem:[%s170_s29 + $0x18] sm:$0xff]  ;;  %v177_v9 = vld [vmem:[%s170_s29 + $0x20] sm:$0xff]  ;;  %v178_v11 = vld [vmem:[%s170_s29 + $0x28] sm:$0xff]  ;;  %p635_p3 = por %p634_p2, %p633_p1 }
  0x1b   : > { %555 = vmatmul.mubr.msk.f32.vlgmr.msra.gmra.mxu1 %vm190_vm0, %v182_v4  ;;  %545 = vmatprep.mubr.msk.f32.mxu0 %vm190_vm0, %v175_v5  ;;  %v184_v8 = vld [vmem:[%s170_s29 + $0x58] sm:$0xff]  ;;  %v185_v10 = vld [vmem:[%s170_s29 + $0x60] sm:$0xff]  ;;  %v186_v12 = vld [vmem:[%s170_s29 + $0x68] sm:$0xff] }
  0x1c   : > { %557 = vmatprep.mubr.msk.f32.mxu1 %vm190_vm0, %v183_v6  ;;  %v179_v13 = vld [vmem:[%s170_s29 + $0x30] sm:$0xff]  ;;  %v180_v15 = vld [vmem:[%s170_s29 + $0x38] sm:$0xff]  ;;  %p636_p5 = pnand %p635_p3, %p629_p0 }
  0x1d   : > { %v187_v14 = vld [vmem:[%s170_s29 + $0x70] sm:$0xff]  ;;  %v188_v16 = vld [vmem:[%s170_s29 + $0x78] sm:$0xff] }
  0x1e   : > { %546 = vmatmul.mubr.msk.f32.gmra.mxu0 %vm190_vm0, %v176_v7 }
  0x1f   : > { %558 = vmatmul.mubr.msk.f32.gmra.mxu1 %vm190_vm0, %v184_v8  ;;  %548 = vmatprep.mubr.msk.f32.mxu0 %vm190_vm0, %v177_v9 }
  0x20   : > { %560 = vmatprep.mubr.msk.f32.mxu1 %vm190_vm0, %v185_v10 }
  0x22   : > { %549 = vmatmul.mubr.msk.f32.gmra.mxu0 %vm190_vm0, %v178_v11 }
  0x23   : > { %561 = vmatmul.mubr.msk.f32.gmra.mxu1 %vm190_vm0, %v186_v12  ;;  %551 = vmatprep.mubr.msk.f32.mxu0 %vm190_vm0, %v179_v13 }
  0x24   : > { %563 = vmatprep.mubr.msk.f32.mxu1 %vm190_vm0, %v187_v14 }
  0x26   : > { %552 = vmatmul.mubr.msk.f32.gmra.mxu0 %vm190_vm0, %v180_v15 }
  0x27   : > { %564 = vmatmul.mubr.msk.f32.gmra.mxu1 %vm190_vm0, %v188_v16 }
  0xda   : > { %v544_v17 = vpop.f32.mrf.mxu0 }
  0xdb   : > { %v556_v18 = vpop.f32.mrf.mxu1  ;;  %385 = vst [vmem:[%s805_s4 + $0x8] sm:$0xff] %v544_v17 }
  0xdc   : > { %393 = vst [vmem:[%s805_s4 + $0x48] sm:$0xff] %v556_v18  ;;  %v305_v19 = vpop.f32.mrf.mxu0 }
  0xdd   : > { %v345_v20 = vpop.f32.mrf.mxu1  ;;  %384 = vst [vmem:[%s805_s4] sm:$0xff] %v305_v19 }
  0xde   : > { %392 = vst [vmem:[%s805_s4 + $0x40] sm:$0xff] %v345_v20  ;;  %v547_v21 = vpop.f32.mrf.mxu0 }
  0xdf   : > { %v559_v22 = vpop.f32.mrf.mxu1  ;;  %387 = vst [vmem:[%s805_s4 + $0x18] sm:$0xff] %v547_v21 }
  0xe0   : > { %395 = vst [vmem:[%s805_s4 + $0x58] sm:$0xff] %v559_v22  ;;  %v315_v23 = vpop.f32.mrf.mxu0 }
  0xe1   : > { %v355_v24 = vpop.f32.mrf.mxu1  ;;  %386 = vst [vmem:[%s805_s4 + $0x10] sm:$0xff] %v315_v23 }
  0xe2   : > { %394 = vst [vmem:[%s805_s4 + $0x50] sm:$0xff] %v355_v24  ;;  %v550_v25 = vpop.f32.mrf.mxu0 }
  0xe3   : > { %v562_v26 = vpop.f32.mrf.mxu1  ;;  %389 = vst [vmem:[%s805_s4 + $0x28] sm:$0xff] %v550_v25 }
  0xe4   : > { %397 = vst [vmem:[%s805_s4 + $0x68] sm:$0xff] %v562_v26  ;;  %v325_v27 = vpop.f32.mrf.mxu0 }
  0xe5   : > { %v365_v28 = vpop.f32.mrf.mxu1  ;;  %388 = vst [vmem:[%s805_s4 + $0x20] sm:$0xff] %v325_v27 }
  0xe6   : > { %396 = vst [vmem:[%s805_s4 + $0x60] sm:$0xff] %v365_v28  ;;  %v553_v29 = vpop.f32.mrf.mxu0 }
  0xe7   : > { %v565_v30 = vpop.f32.mrf.mxu1  ;;  %391 = vst [vmem:[%s805_s4 + $0x38] sm:$0xff] %v553_v29 }
  0xe8   : > { %399 = vst [vmem:[%s805_s4 + $0x78] sm:$0xff] %v565_v30  ;;  %v335_v31 = vpop.f32.mrf.mxu0 }
  0xe9   : > { %v375_v32 = vpop.f32.mrf.mxu1  ;;  %390 = vst [vmem:[%s805_s4 + $0x30] sm:$0xff] %v335_v31 }
  0xea   : > { %398 = vst [vmem:[%s805_s4 + $0x70] sm:$0xff] %v375_v32 }
  0xeb   : > { %639 = shalt.err (!%p636_p5)
}
  0xec   : > { %s640_s24 = scalar_lea.hbm %s824_s15, 2048  ;;  %s644_s27 = scalar_lea.hbm %s881_s2, 4096 }
  0xed   : > { %p641_p6 = scmp.ne.s32.totalorder %s824_s15, %s640_s24  ;;  %p645_p10 = scmp.lt.s32.totalorder %s824_s15, %s881_s2 }
  0xee   : > { %p646_p11 = scmp.lt.s32.totalorder %s644_s27, %s640_s24 }
  0xef   : > { %p642_p7 = pnand %p641_p6, %p763_p4 }
  0xf0   : > { %p647_p12 = por %p646_p11, %p645_p10 }
  0xf1   : > { %p643_p9 = pneg %p642_p7 }
  0xf3   : > { %p648_p13 = pnand %p647_p12, %p643_p9 }
  0xf5   : > { %651 = shalt.err (!%p648_p13)
}
  0xf6   : > { %s705_s30 = smov 128   ;;  %s706_s3 = smov 256  }
  0xf7   : > { %s707_s4 = smov 8  }
  0xf8   : > { %568 = dma.vmem_to_hbm [thread:$0]  (%p763_p4), %s826_s6, 2048, %s824_s15, %s834_s12, %s705_s30, %s706_s3, %s707_s4  }
  0xf9 PF: > { %p574_p0 = scmp.ge.s32.totalorder %s702_s14, 2  ;;  %s431_s5 = sand.u32 1, %s682_s9  }
  0xfa   : > { %s432_s7 = scalar_lea.sflag [#allocation3], %s431_s5 }
  0xfb   : > { %p571_p1 = pnand %p574_p0, %p770_p8 }
  0xfd   : > { %p572_p2 = pneg %p571_p1 }
  0xff   : > { %677 = dma.done.wait (%p572_p2), %s432_s7, 2048  }
 0x100   : > { %679 = vsyncadd (%p572_p2), %s432_s7, 4294965248  ;;  %s15_s14 = sadd.s32 1, %s702_s14   ;;  %s884_s9 = smov %s686_s10 }
 0x101   : > { %p12_p3 = scmp.ge.s32.totalorder %s15_s14, 4   ;;  %s885_s10 = smov %s690_s11 }
 0x102   : > { %s886_s11 = smov %s776_s22  ;;  %s887_s12 = smov %s698_s13 }
 0x103   : > { %s888_s13 = smov %s890_s17  ;;  %14 = sbr.rel (!%p12_p3) target bundleno = 4 (0x4), region = 63 }
 0x108   :  { %437 = vsyncpa [#allocation3], 1 }
 0x109   :  { %439 = vsyncpa [#allocation3 + $0x1], 1 }

</bundles_post_ra>
